<compile_context>
chip_gen: v7x
topology: tpu7x:2x2x1
jax: 0.10.0
libtpu: 0.0.40
codegen_flags: <defaults>
</compile_context>

<pallas_src>
import functools

import jax
import jax.numpy as jnp
from jax.experimental import pallas as pl
from jax.experimental.pallas import tpu as pltpu


def _round_up(x, m):
    return ((x + m - 1) // m) * m


def _irt_kernel(T, H, theta_pack_ref, item_ref, w_ref, b_ref, wd1_ref, out_ref):
    """One batch tile of the MultiIRT forward pass.

    theta_pack_ref: (TB, 2T+1)  = [theta | theta_icl | icl_flag]
    item_ref:       (TB, F)
    w_ref:          (F, NP)     = [w_traits | w_traits_icl | w_d0 | 0-pad]
    b_ref:          (1, NP)     = [b_traits | b_traits_icl | b_d0 | 20.0 | 0-pad]
    wd1_ref:        (1, H+1)    = [w_d1^T | b_d1]
    out_ref:        (TB, 4)     = [logits | difficulty | learnability | match]
    """
    item = item_ref[...]                                             # (TB, F)

    # Single fused projection + tanh for all three branches (one MXU pass,
    # one EUP pass).
    fused = jnp.tanh(
        jnp.dot(item, w_ref[...], preferred_element_type=jnp.float32)
        + b_ref[...])                                                # (TB, NP)

    tp = theta_pack_ref[...]                                         # (TB, 2T+1)
    theta = tp[:, 0:T]                                               # (TB, T)
    theta_icl = tp[:, T:2 * T]                                       # (TB, T)
    icl = tp[:, 2 * T:2 * T + 1]                                     # (TB, 1)

    item_trait = fused[:, 0:T]                                       # tanh(item @ w_traits + b)
    item_trait_icl = fused[:, T:2 * T]                               # tanh(item @ w_traits_icl + b)
    # fused[:, 2T:2T+H]   = h = tanh(item @ w_d0 + b_d0)
    # fused[:, 2T+H]      = tanh(20.0) == 1.0  (constant-one column -> b_d1 fold)
    h_aug = fused[:, 2 * T:2 * T + H + 1]                            # (TB, H+1)

    match = jnp.sum(theta * item_trait, axis=-1, keepdims=True)              # (TB, 1)
    learn = jnp.sum(theta_icl * item_trait_icl, axis=-1, keepdims=True)      # (TB, 1)
    # difficulty = h @ w_d1 + b_d1, done on the VPU/XLU (no 1-column matmul).
    difficulty = jnp.sum(h_aug * wd1_ref[...], axis=-1, keepdims=True)       # (TB, 1)

    logits = match - difficulty + icl * learn

    out_ref[:, 0:1] = logits
    out_ref[:, 1:2] = difficulty
    out_ref[:, 2:3] = learn
    out_ref[:, 3:4] = match


def multi_irt_forward(params, tester_id, item_repr, icl_flag, *, batch_tile=512):
    """Pallas implementation of MultiIRT.forward.

    params: dict with embedding tables + linear weights/biases.
    tester_id: (B,) int32
    item_repr: (B, item_ftr_dim) float32
    icl_flag:  (B, 1) float32
    Returns dict {'logits','difficulty','learnability','match'}, each (B, 1).
    """
    B, F = item_repr.shape
    T = params["theta"].shape[1]
    H = params["w_d0"].shape[1]
    # +1 column reserved for the constant-one (b_d1 fold); pad lanes to 128.
    NP = _round_up(2 * T + H + 1, 128)

    # ---- glue: embedding gather (data-dependent lookup) + input packing ----
    theta_g = jnp.take(params["theta"], tester_id, axis=0)              # (B, T)
    theta_icl_g = jnp.take(params["theta_icl"], tester_id, axis=0)      # (B, T)
    theta_pack = jnp.concatenate(
        [theta_g, theta_icl_g, icl_flag.astype(jnp.float32)], axis=1)   # (B, 2T+1)

    # ---- fused / padded weights (tiny, built once per call) ----
    w_cat = jnp.concatenate(
        [params["w_traits"], params["w_traits_icl"], params["w_d0"]], axis=1)   # (F, 2T+H)
    w_fused = jnp.pad(w_cat, ((0, 0), (0, NP - (2 * T + H))))                   # (F, NP)
    b_cat = jnp.concatenate(
        [params["b_traits"], params["b_traits_icl"], params["b_d0"],
         jnp.full((1, 1), 20.0, jnp.float32)], axis=1)                          # (1, 2T+H+1)
    b_fused = jnp.pad(b_cat, ((0, 0), (0, NP - (2 * T + H + 1))))               # (1, NP)
    wd1_ext = jnp.concatenate(
        [params["w_d1"].reshape(1, H), params["b_d1"].reshape(1, 1)], axis=1)   # (1, H+1)

    # ---- batch tiling: large tiles, cdiv grid, pad the tail ----
    batch_tile = max(8, _round_up(batch_tile, 8))
    # Cap the tile so double-buffered streamed tiles stay well under VMEM
    # (item + lane-padded theta_pack + lane-padded out, x2 buffers <= ~8 MiB).
    bytes_per_row = 4 * (F + _round_up(2 * T + 1, 128) + 128)
    vmem_cap_rows = max(8, ((8 << 20) // (2 * bytes_per_row)) // 8 * 8)
    TB = min(batch_tile, vmem_cap_rows, _round_up(max(B, 1), 8))
    Bp = _round_up(B, TB)
    if Bp != B:
        pad = Bp - B
        item_repr = jnp.pad(item_repr, ((0, pad), (0, 0)))
        theta_pack = jnp.pad(theta_pack, ((0, pad), (0, 0)))
    grid = (Bp // TB,)

    in_specs = [
        pl.BlockSpec((TB, 2 * T + 1), lambda i: (i, 0)),   # theta_pack (streamed)
        pl.BlockSpec((TB, F), lambda i: (i, 0)),           # item_repr  (streamed)
        pl.BlockSpec((F, NP), lambda i: (0, 0)),           # fused weight (resident)
        pl.BlockSpec((1, NP), lambda i: (0, 0)),           # fused bias   (resident)
        pl.BlockSpec((1, H + 1), lambda i: (0, 0)),        # [w_d1^T | b_d1] row
    ]
    out_specs = pl.BlockSpec((TB, 4), lambda i: (i, 0))
    out_shape = jax.ShapeDtypeStruct((Bp, 4), jnp.float32)

    cost = pl.CostEstimate(
        flops=int(2 * Bp * F * NP + 8 * Bp * (2 * T + H + 1)),
        transcendentals=int(Bp * NP),
        bytes_accessed=int(4 * (Bp * (2 * T + 1) + Bp * F + F * NP + NP
                                + (H + 1) + Bp * 4)),
    )

    out = pl.pallas_call(
        functools.partial(_irt_kernel, T, H),
        out_shape=out_shape,
        grid_spec=pltpu.PrefetchScalarGridSpec(
            num_scalar_prefetch=0,
            grid=grid,
            in_specs=in_specs,
            out_specs=out_specs,
        ),
        compiler_params=pltpu.CompilerParams(
            dimension_semantics=("parallel",)),
        cost_estimate=cost,
    )(theta_pack, item_repr, w_fused, b_fused, wd1_ext)

    out = out[:B]
    return {
        "logits": out[:, 0:1],
        "difficulty": out[:, 1:2],
        "learnability": out[:, 2:3],
        "match": out[:, 3:4],
    }


def init_params(key, num_testers, item_ftr_dim, trait_dim=32):
    """Deterministic synthetic parameter init (shapes match MultiIRT.__init__)."""
    ks = jax.random.split(key, 10)
    H = item_ftr_dim // 2
    s = 0.1
    return {
        "theta": s * jax.random.normal(ks[0], (num_testers, trait_dim), jnp.float32),
        "theta_icl": s * jax.random.normal(ks[1], (num_testers, trait_dim), jnp.float32),
        "w_traits": s * jax.random.normal(ks[2], (item_ftr_dim, trait_dim), jnp.float32),
        "b_traits": s * jax.random.normal(ks[3], (1, trait_dim), jnp.float32),
        "w_traits_icl": s * jax.random.normal(ks[4], (item_ftr_dim, trait_dim), jnp.float32),
        "b_traits_icl": s * jax.random.normal(ks[5], (1, trait_dim), jnp.float32),
        "w_d0": s * jax.random.normal(ks[6], (item_ftr_dim, H), jnp.float32),
        "b_d0": s * jax.random.normal(ks[7], (1, H), jnp.float32),
        "w_d1": s * jax.random.normal(ks[8], (H, 1), jnp.float32),
        "b_d1": s * jax.random.normal(ks[9], (1, 1), jnp.float32),
    }


def _reference_forward(params, tester_id, item_repr, icl_flag):
    """Pure-JAX reference mirroring the PyTorch module semantics."""
    theta = jnp.take(params["theta"], tester_id, axis=0)
    theta_icl = jnp.take(params["theta_icl"], tester_id, axis=0)
    item_trait = jnp.tanh(item_repr @ params["w_traits"] + params["b_traits"])
    item_trait_icl = jnp.tanh(item_repr @ params["w_traits_icl"] + params["b_traits_icl"])
    h = jnp.tanh(item_repr @ params["w_d0"] + params["b_d0"])
    difficulty = h @ params["w_d1"] + params["b_d1"]
    match = jnp.sum(theta * item_trait, axis=-1, keepdims=True)
    learn = jnp.sum(item_trait_icl * theta_icl, axis=-1, keepdims=True)
    return {
        "logits": match - difficulty + icl_flag * learn,
        "difficulty": difficulty,
        "learnability": learn,
        "match": match,
    }


if __name__ == "__main__":
    num_testers = 16
    item_ftr_dim = 64
    trait_dim = 32

    key = jax.random.PRNGKey(0)
    k_param = jax.random.fold_in(key, 17)
    params = init_params(k_param, num_testers, item_ftr_dim, trait_dim)

    # batch=8 exercises the small-tile path, batch=300 exercises cdiv + padding.
    for batch in (8, 300):
        kb = jax.random.fold_in(key, batch)
        k_id, k_item, k_icl = jax.random.split(kb, 3)
        tester_id = jax.random.randint(k_id, (batch,), 0, num_testers, dtype=jnp.int32)
        item_repr = jax.random.normal(k_item, (batch, item_ftr_dim), jnp.float32)
        icl_flag = jax.random.bernoulli(k_icl, 0.5, (batch, 1)).astype(jnp.float32)

        out = multi_irt_forward(params, tester_id, item_repr, icl_flag, batch_tile=512)
        out = jax.block_until_ready(out)

        ref = _reference_forward(params, tester_id, item_repr, icl_flag)
        for name in ("logits", "difficulty", "learnability", "match"):
            assert out[name].shape == (batch, 1), (name, out[name].shape)
            assert jnp.allclose(out[name], ref[name], atol=2e-5, rtol=2e-5), name

    print("KERNEL_OK")
</pallas_src>

<mosaic_0001>
module attributes {stable_mosaic.version = 11 : i64} {
  func.func @_irt_kernel(%arg0: i32, %arg1: memref<8x65xf32, #tpu.memory_space<vmem>>, %arg2: memref<8x64xf32, #tpu.memory_space<vmem>>, %arg3: memref<64x128xf32, #tpu.memory_space<vmem>>, %arg4: memref<1x128xf32, #tpu.memory_space<vmem>>, %arg5: memref<1x33xf32, #tpu.memory_space<vmem>>, %arg6: memref<8x4xf32, #tpu.memory_space<vmem>>) attributes {dimension_semantics = [#tpu.dimension_semantics<parallel>], iteration_bounds = array<i64: 1>, scalar_prefetch = 0 : i64, scratch_operands = 0 : i64, tpu.core_type = #tpu.core_type<tc>, window_params = [{transform_indices = @transform_0, window_bounds = array<i64: 8, 65>}, {transform_indices = @transform_1, window_bounds = array<i64: 8, 64>}, {pipeline_mode = #tpu.pipeline_mode<synchronous>, transform_indices = @transform_2, window_bounds = array<i64: 64, 128>}, {pipeline_mode = #tpu.pipeline_mode<synchronous>, transform_indices = @transform_3, window_bounds = array<i64: 1, 128>}, {pipeline_mode = #tpu.pipeline_mode<synchronous>, transform_indices = @transform_4, window_bounds = array<i64: 1, 33>}, {transform_indices = @transform_5, window_bounds = array<i64: 8, 4>}]} {
    %c0 = arith.constant 0 : index
    %c0_0 = arith.constant 0 : index
    %0 = vector.load %arg2[%c0, %c0_0] : memref<8x64xf32, #tpu.memory_space<vmem>>, vector<8x64xf32>
    %c0_1 = arith.constant 0 : index
    %c0_2 = arith.constant 0 : index
    %1 = vector.load %arg3[%c0_1, %c0_2] : memref<64x128xf32, #tpu.memory_space<vmem>>, vector<64x128xf32>
    %cst = arith.constant dense<0.000000e+00> : vector<8x128xf32>
    %2 = tpu.matmul %0, %1, %cst {dimension_numbers = #tpu.dot_dimension_numbers<[1], [0], [0], [1], [0, 0, 1, 1], [], []>} : vector<8x64xf32>, vector<64x128xf32>, vector<8x128xf32> -> vector<8x128xf32>
    %c0_3 = arith.constant 0 : index
    %c0_4 = arith.constant 0 : index
    %3 = vector.load %arg4[%c0_3, %c0_4] : memref<1x128xf32, #tpu.memory_space<vmem>>, vector<1x128xf32>
    %4 = vector.broadcast %3 : vector<1x128xf32> to vector<8x128xf32>
    %5 = arith.addf %2, %4 : vector<8x128xf32>
    %6 = math.tanh %5 : vector<8x128xf32>
    %c0_5 = arith.constant 0 : index
    %c0_6 = arith.constant 0 : index
    %7 = vector.load %arg1[%c0_5, %c0_6] : memref<8x65xf32, #tpu.memory_space<vmem>>, vector<8x65xf32>
    %8 = vector.extract_strided_slice %7 {offsets = [0, 0], sizes = [8, 32], strides = [1, 1]} : vector<8x65xf32> to vector<8x32xf32>
    %9 = vector.extract_strided_slice %7 {offsets = [0, 32], sizes = [8, 32], strides = [1, 1]} : vector<8x65xf32> to vector<8x32xf32>
    %10 = vector.extract_strided_slice %7 {offsets = [0, 64], sizes = [8, 1], strides = [1, 1]} : vector<8x65xf32> to vector<8x1xf32>
    %11 = vector.extract_strided_slice %6 {offsets = [0, 0], sizes = [8, 32], strides = [1, 1]} : vector<8x128xf32> to vector<8x32xf32>
    %12 = vector.extract_strided_slice %6 {offsets = [0, 32], sizes = [8, 32], strides = [1, 1]} : vector<8x128xf32> to vector<8x32xf32>
    %13 = vector.extract_strided_slice %6 {offsets = [0, 64], sizes = [8, 33], strides = [1, 1]} : vector<8x128xf32> to vector<8x33xf32>
    %14 = arith.mulf %8, %11 : vector<8x32xf32>
    %cst_7 = arith.constant dense<0.000000e+00> : vector<8xf32>
    %15 = vector.multi_reduction <add>, %14, %cst_7 [1] : vector<8x32xf32> to vector<8xf32>
    %16 = vector.shape_cast %15 : vector<8xf32> to vector<8x1xf32>
    %17 = arith.mulf %9, %12 : vector<8x32xf32>
    %cst_8 = arith.constant dense<0.000000e+00> : vector<8xf32>
    %18 = vector.multi_reduction <add>, %17, %cst_8 [1] : vector<8x32xf32> to vector<8xf32>
    %19 = vector.shape_cast %18 : vector<8xf32> to vector<8x1xf32>
    %c0_9 = arith.constant 0 : index
    %c0_10 = arith.constant 0 : index
    %20 = vector.load %arg5[%c0_9, %c0_10] : memref<1x33xf32, #tpu.memory_space<vmem>>, vector<1x33xf32>
    %21 = vector.broadcast %20 : vector<1x33xf32> to vector<8x33xf32>
    %22 = arith.mulf %13, %21 : vector<8x33xf32>
    %cst_11 = arith.constant dense<0.000000e+00> : vector<8xf32>
    %23 = vector.multi_reduction <add>, %22, %cst_11 [1] : vector<8x33xf32> to vector<8xf32>
    %24 = vector.shape_cast %23 : vector<8xf32> to vector<8x1xf32>
    %25 = arith.subf %16, %24 : vector<8x1xf32>
    %26 = arith.mulf %10, %19 : vector<8x1xf32>
    %27 = arith.addf %25, %26 : vector<8x1xf32>
    %c0_12 = arith.constant 0 : index
    %c0_13 = arith.constant 0 : index
    %28 = vector.load %arg6[%c0_12, %c0_13] : memref<8x4xf32, #tpu.memory_space<vmem>>, vector<8x1xf32>
    tpu.vector_store %arg6[%c0_12, %c0_13], %27 {strides = array<i32>} : memref<8x4xf32, #tpu.memory_space<vmem>>, vector<8x1xf32>,
    %c0_14 = arith.constant 0 : index
    %c1 = arith.constant 1 : index
    %29 = vector.load %arg6[%c0_14, %c1] : memref<8x4xf32, #tpu.memory_space<vmem>>, vector<8x1xf32>
    tpu.vector_store %arg6[%c0_14, %c1], %24 {strides = array<i32>} : memref<8x4xf32, #tpu.memory_space<vmem>>, vector<8x1xf32>,
    %c0_15 = arith.constant 0 : index
    %c2 = arith.constant 2 : index
    %30 = vector.load %arg6[%c0_15, %c2] : memref<8x4xf32, #tpu.memory_space<vmem>>, vector<8x1xf32>
    tpu.vector_store %arg6[%c0_15, %c2], %19 {strides = array<i32>} : memref<8x4xf32, #tpu.memory_space<vmem>>, vector<8x1xf32>,
    %c0_16 = arith.constant 0 : index
    %c3 = arith.constant 3 : index
    %31 = vector.load %arg6[%c0_16, %c3] : memref<8x4xf32, #tpu.memory_space<vmem>>, vector<8x1xf32>
    tpu.vector_store %arg6[%c0_16, %c3], %16 {strides = array<i32>} : memref<8x4xf32, #tpu.memory_space<vmem>>, vector<8x1xf32>,
    return
  }
  func.func @transform_0(%arg0: i32) -> (i32, i32) {
    %c0_i32 = arith.constant 0 : i32
    %c0_i32_0 = arith.constant 0 : i32
    return %arg0, %c0_i32 : i32, i32
  }
  func.func @transform_1(%arg0: i32) -> (i32, i32) {
    %c0_i32 = arith.constant 0 : i32
    %c0_i32_0 = arith.constant 0 : i32
    return %arg0, %c0_i32 : i32, i32
  }
  func.func @transform_2(%arg0: i32) -> (i32, i32) {
    %c0_i32 = arith.constant 0 : i32
    %c0_i32_0 = arith.constant 0 : i32
    %c0_i32_1 = arith.constant 0 : i32
    return %c0_i32, %c0_i32_0 : i32, i32
  }
  func.func @transform_3(%arg0: i32) -> (i32, i32) {
    %c0_i32 = arith.constant 0 : i32
    %c0_i32_0 = arith.constant 0 : i32
    %c0_i32_1 = arith.constant 0 : i32
    return %c0_i32, %c0_i32_0 : i32, i32
  }
  func.func @transform_4(%arg0: i32) -> (i32, i32) {
    %c0_i32 = arith.constant 0 : i32
    %c0_i32_0 = arith.constant 0 : i32
    %c0_i32_1 = arith.constant 0 : i32
    return %c0_i32, %c0_i32_0 : i32, i32
  }
  func.func @transform_5(%arg0: i32) -> (i32, i32) {
    %c0_i32 = arith.constant 0 : i32
    %c0_i32_0 = arith.constant 0 : i32
    return %arg0, %c0_i32 : i32, i32
  }
}

</mosaic_0001>

<bundles_post_ra>
// kernel: tpu_custom_call.1
= control target key start
LH: loop header
LB: loop body
LE: loop exit
PB: predicated region body
PF: predicated region fallthrough
CT: control target
= control target key end

     0   :  { %10 = vsyncpa [#allocation3], 0  ;;  %s422_s0 = inlined_call_operand.hbm [shape: f32[8,65], index: 0, kind: input, shape index: {}]   ;;  %s423_s1 = inlined_call_operand.hbm [shape: f32[8,64], index: 1, kind: input, shape index: {}]   ;;  %s424_s2 = inlined_call_operand.hbm [shape: f32[64,128], index: 2, kind: input, shape index: {}]   ;;  %s425_s3 = inlined_call_operand.vmem [shape: f32[1,128], index: 3, kind: input, shape index: {}]   ;;  %s426_s4 = inlined_call_operand.vmem [shape: f32[1,33], index: 4, kind: input, shape index: {}]   ;;  %s427_s5 = inlined_call_operand.vmem [shape: f32[8,4], index: 5, kind: output, shape index: {}]  }
   0x1   :  { %11 = vsyncpa [#allocation5], 0  ;;  %s325_s18 = smov [#allocation4]   ;;  %s326_s20 = smov [#allocation2]  }
   0x2   :  { %s28_s19 = sshll.u32 %s325_s18, 4  ;;  %s18_s21 = sshll.u32 %s326_s20, 4  ;;  %s29_s19 = int_to_ptr.vmem [resolvable:$true] %s28_s19  ;;  %s19_s21 = int_to_ptr.vmem [resolvable:$true] %s18_s21 }
   0x3   :  { %s255_s24 = scalar_lea.hbm %s423_s1, 128 }
   0x4   :  { %p256_p0 = scmp.ne.s32.totalorder %s423_s1, %s255_s24  ;;  %p259_p1 = scmp.lt.u32.totalorder %s255_s24, %s423_s1 }
   0x6   :  { %p261_p2 = pnand %p259_p1, %p256_p0 }
   0x8   :  { %264 = shalt.err (!%p261_p2)
}
   0x9   :  { %s265_s29 = scalar_lea.vmem %s29_s19, 128  ;;  %p270_p4 = scmp.lt.s32.totalorder %s29_s19, %s29_s19 }
   0xa   :  { %p266_p3 = scmp.ne.s32.totalorder %s29_s19, %s265_s29  ;;  %p271_p5 = scmp.lt.s32.totalorder %s265_s29, %s265_s29 }
   0xc   :  { %p272_p6 = por %p271_p5, %p270_p4 }
   0xe   :  { %p273_p7 = pnand %p272_p6, %p266_p3 }
  0x10   :  { %276 = shalt.err (!%p273_p7)
}
  0x11   :  { %31 = dma.hbm_to_vmem [thread:$0]  %s423_s1, 128, %s29_s19, [#allocation5]  }
  0x12   :  { %s277_s9 = scalar_lea.hbm %s422_s0, 128 }
  0x13   :  { %p278_p8 = scmp.ne.s32.totalorder %s422_s0, %s277_s9  ;;  %p281_p9 = scmp.lt.u32.totalorder %s277_s9, %s422_s0 }
  0x15   :  { %p283_p10 = pnand %p281_p9, %p278_p8 }
  0x17   :  { %286 = shalt.err (!%p283_p10)
}
  0x18   :  { %s287_s14 = scalar_lea.vmem %s19_s21, 128  ;;  %p292_p12 = scmp.lt.s32.totalorder %s19_s21, %s19_s21 }
  0x19   :  { %p288_p11 = scmp.ne.s32.totalorder %s19_s21, %s287_s14  ;;  %p293_p13 = scmp.lt.s32.totalorder %s287_s14, %s287_s14 }
  0x1b   :  { %p294_p0 = por %p293_p13, %p292_p12 }
  0x1d   :  { %p295_p1 = pnand %p294_p0, %p288_p11 }
  0x1f   :  { %298 = shalt.err (!%p295_p1)
}
  0x20   :  { %21 = dma.hbm_to_vmem [thread:$0]  %s422_s0, 128, %s19_s21, [#allocation3]  }
  0x21   :  { %s327_s16 = smov [#allocation6]   ;;  %s299_s20 = scalar_lea.hbm %s424_s2, 1024 }
  0x22   :  { %s37_s17 = sshll.u32 %s327_s16, 4  ;;  %p300_p2 = scmp.ne.s32.totalorder %s424_s2, %s299_s20  ;;  %s38_s17 = int_to_ptr.vmem [resolvable:$true] %s37_s17 }
  0x23   :  { %p303_p3 = scmp.lt.u32.totalorder %s299_s20, %s424_s2 }
  0x25   :  { %p305_p4 = pnand %p303_p3, %p300_p2 }
  0x27   :  { %308 = shalt.err (!%p305_p4)
}
  0x28   :  { %s309_s26 = scalar_lea.vmem %s38_s17, 1024  ;;  %p314_p6 = scmp.lt.s32.totalorder %s38_s17, %s38_s17 }
  0x29   :  { %p310_p5 = scmp.ne.s32.totalorder %s38_s17, %s309_s26  ;;  %p315_p7 = scmp.lt.s32.totalorder %s309_s26, %s309_s26 }
  0x2b   :  { %p316_p8 = por %p315_p7, %p314_p6 }
  0x2d   :  { %p317_p9 = pnand %p316_p8, %p310_p5 }
  0x2f   :  { %320 = shalt.err (!%p317_p9)
}
  0x30   :  { %s328_s0 = smov 128   ;;  %s329_s21 = smov 8  }
  0x31   :  { %43 = dma.hbm_to_vmem [thread:$0]  %s424_s2, 1024, %s38_s17, [#allocation5], %s328_s0, %s328_s0, %s329_s21  }
  0x32   :  { %321 = dma.done.wait [#allocation3], 128  }
  0x33   :  { %322 = vsyncadd [#allocation3], 4294967168 }
  0x34   :  { %323 = dma.done.wait [#allocation5], 1152  }
  0x35   :  { %324 = vsyncadd [#allocation5], 4294966144  ;;  %v330_v0 = vmov 0.0|0.0   ;;  %vm331_vm0 = vmmov 0   ;;  %v332_v1 = vmov 0.0   ;;  %v58_v2 = vld [vmem:[#allocation6] sm:$0xff] }
  0x36   :  { %231 = vmatprep.subr.bf16.mxu0 %v330_v0  ;;  %228 = vmatprep.mubr.msk.f32.mxu0 %vm331_vm0, %v332_v1  ;;  %v59_v3 = vld [vmem:[#allocation6 + $0x8] sm:$0xff]  ;;  %v60_v4 = vld [vmem:[#allocation6 + $0x10] sm:$0xff]  ;;  %v61_v6 = vld [vmem:[#allocation6 + $0x18] sm:$0xff]  ;;  %s333_s2 = smov 64   ;;  %vm73_vm1 = vcmask 523264   ;;  %s334_s7 = smov 96  }
  0x37   :  { %v232_v5 = vpack.c.bf16 %v59_v3, %v58_v2  ;;  %v235_v7 = vpack.c.bf16 %v61_v6, %v60_v4  ;;  %v202_v8 = vld [vmem:[%s426_s4] ss:$0 sm:$0xff]  ;;  %v62_v9 = vld [vmem:[#allocation6 + $0x20] sm:$0xff]  ;;  %v63_v10 = vld [vmem:[#allocation6 + $0x28] sm:$0xff]  ;;  %vm150_vm2 = vcmask 261120   ;;  %vm175_vm3 = vcmask 269312  }
  0x38   :  { %167 = vrot.lane.b32.xlu0 %v202_v8, %s333_s2  ;;  %v238_v11 = vpack.c.bf16 %v63_v10, %v62_v9  ;;  %v64_v12 = vld [vmem:[#allocation6 + $0x30] sm:$0xff]  ;;  %v65_v13 = vld [vmem:[#allocation6 + $0x38] sm:$0xff]  ;;  %vm186_vm4 = vcmask 7168   ;;  %vm188_vm5 = vcmask 15368   ;;  %vm190_vm6 = vcmask 23568  }
  0x39   :  { %233 = vmatpush3.bf16.msra.mxu0 %v232_v5  ;;  %v241_v14 = vpack.c.bf16 %v65_v13, %v64_v12  ;;  %v57_v15 = vld [vmem:[#allocation4] sm:$0xff]  ;;  %v200_v16 = vld [vmem:[%s425_s3] ss:$0 sm:$0xff]  ;;  %vm192_vm7 = vcmask 31768  }
  0x3a   :  { %234 = vmatprep.subr.bf16.mxu0 %v330_v0  ;;  %v148_v21 = vld [vmem:[#allocation2] sm:$0xff] }
  0x3d   :  { %236 = vmatpush3.bf16.msra.mxu0 %v235_v7 }
  0x3e   :  { %237 = vmatprep.subr.bf16.mxu0 %v330_v0 }
  0x41   :  { %239 = vmatpush3.bf16.msra.mxu0 %v238_v11 }
  0x42   :  { %240 = vmatprep.subr.bf16.mxu0 %v330_v0 }
  0x45   :  { %242 = vmatpush3.bf16.msra.mxu0 %v241_v14 }
  0x48   :  { %229 = vmatmul.mubr.msk.f32.vlgmr.msra.gmra.mrb[0].mxu0 %vm73_vm1, %v57_v15 }
  0xaa   :  { %v168_v20 = vpop.permute.xlu0 %167 }
 0x11b   :  { %v143_v17 = vpop.f32.mrb[0].mxu0 }
 0x11c   :  { %v144_v18 = vadd.f32 %v200_v16, %v143_v17  ;;  %v230_v19 = vpop.f32.mrb[1].mxu0 }
 0x11e   :  { %253 = vtanh.f32 %v144_v18 }
 0x128   :  { %v254_v22 = vpop.eup %253 }
 0x129   :  { %v170_v23 = vmul.f32 %v254_v22, %v168_v20  ;;  %v149_v24 = vmul.f32 %v254_v22, %v148_v21 }
 0x12b   :  { %172 = vrot.lane.b32.xlu1 %v170_v23, %s333_s2  ;;  %155 = vrot.lane.b32.xlu0 %v149_v24, %s334_s7  ;;  %v151_v25 = vsel %vm150_vm2, %v149_v24, 0.0 }
 0x14f   :  { %152 = vadd.xlane.f32.xlu1 %v151_v25 }
 0x19d   :  { %v156_v26 = vpop.permute.xlu0 %155  ;;  %v173_v28 = vpop.permute.xlu1 %172 }
 0x19e   :  { %v158_v27 = vsel %vm150_vm2, %v156_v26, 0.0  ;;  %v176_v29 = vsel %vm175_vm3, %v173_v28, 0.0 }
 0x19f   :  { %159 = vadd.xlane.f32.xlu0 %v158_v27 }
 0x1a3   :  { %177 = vadd.xlane.f32.xlu0 %v176_v29 }
 0x1dc   :  { %v153_v31 = vpop.xlane.xlu1 %152 }
 0x22c   :  { %v160_v30 = vpop.xlane.xlu0 %159 }
 0x22d   :  { %v180_v33 = vmul.f32 %v160_v30, %v148_v21 }
 0x230   :  { %v178_v32 = vpop.xlane.xlu0 %177 }
 0x231   :  { %v179_v34 = vsub.f32 %v153_v31, %v178_v32 }
 0x233   :  { %v181_v35 = vadd.f32 %v180_v33, %v179_v34 }
 0x235   :  { %183 = vrot.lane.b32.xlu1 %v181_v35, %s333_s2 }
 0x2a7   :  { %v184_v36 = vpop.permute.xlu1 %183 }
 0x2a8   :  { %187 = vst.msk [vmem:[%s427_s5] sm:$0xff] %vm186_vm4, %v184_v36 }
 0x2a9   :  { %189 = vst.msk [vmem:[%s427_s5] sm:$0xff] %vm188_vm5, %v178_v32 }
 0x2aa   :  { %191 = vst.msk [vmem:[%s427_s5] sm:$0xff] %vm190_vm6, %v160_v30 }
 0x2ab   :  { %193 = vst.msk [vmem:[%s427_s5] sm:$0xff] %vm192_vm7, %v153_v31 }
 0x2ac   :  { %198 = vsyncpa [#allocation3], 1 }
 0x2ad   :  { %199 = vsyncpa [#allocation5], 1 }

</bundles_post_ra>
